<compile_context>
chip_gen: v7x
topology: tpu7x:2x2x1
jax: 0.10.0
libtpu: 0.0.40
codegen_flags: <defaults>
</compile_context>

<pallas_src>
import math
import numpy as np
import jax
import jax.numpy as jnp
from jax.experimental import pallas as pl
from jax.experimental.pallas import tpu as pltpu


# ----------------------------- small utilities --------------------------------

def _round_up(x, m):
    return ((x + m - 1) // m) * m


def _vmem_limit_bytes(frac=0.85, fallback=64 * 1024 * 1024):
    # Generation-aware VMEM budget (v5e/v6e: 128 MiB, v7x: 64 MiB per core).
    try:
        return int(pltpu.get_tpu_info().vmem_capacity_bytes * frac)
    except Exception:
        return fallback


def _sigmoid(x):
    # sigmoid(x) = 0.5 * tanh(0.5 x) + 0.5 : one EUP push instead of exp + recip.
    return 0.5 * jnp.tanh(0.5 * x) + 0.5


def _pack_gate_weights(w, hp, in_pad=None):
    """(4, D, H) -> (D or in_pad, 4*Hp) f32; each gate zero-padded H->Hp (order i,f,g,o)."""
    g, d, h = w.shape
    dp = d if in_pad is None else in_pad
    out = jnp.zeros((dp, g * hp), jnp.float32)
    for k in range(g):
        out = out.at[:d, k * hp:k * hp + h].set(w[k].astype(jnp.float32))
    return out


def _pack_gate_bias(b, hp):
    """(4, 1, H) -> (1, 4*Hp) f32; each gate zero-padded H->Hp."""
    g, h = b.shape[0], b.shape[-1]
    out = jnp.zeros((1, g * hp), jnp.float32)
    for k in range(g):
        out = out.at[0, k * hp:k * hp + h].set(b[k].reshape(-1).astype(jnp.float32))
    return out


# --------------------- Pallas kernel 1: input projection ----------------------
# (R, I) @ (I, 4Hp) + bias -> (R, 4Hp); time-independent, fully parallel.

def _input_proj_kernel(x_ref, w_ref, b_ref, o_ref):
    o_ref[...] = (jnp.dot(x_ref[...], w_ref[...],
                          preferred_element_type=jnp.float32)
                  + b_ref[...]).astype(o_ref.dtype)


def _input_projection(x_rows, w_ih_packed, bias, *, out_dtype):
    R, I = x_rows.shape
    G = w_ih_packed.shape[1]
    rt = math.gcd(R, 512)        # row tile (R is a multiple of 8 by construction)
    gt = math.gcd(G, 512)        # 4Hp output tile (G is a multiple of 512)
    # TODO(synk): tile I as an extra "arbitrary" K axis for very large input sizes.
    return pl.pallas_call(
        _input_proj_kernel,
        out_shape=jax.ShapeDtypeStruct((R, G), out_dtype),
        grid_spec=pltpu.PrefetchScalarGridSpec(
            num_scalar_prefetch=0,
            grid=(R // rt, G // gt),
            in_specs=[
                pl.BlockSpec((rt, I), lambda r, j: (r, 0)),   # x rows (native layout)
                pl.BlockSpec((I, gt), lambda r, j: (0, j)),   # fused W_ih tile
                pl.BlockSpec((1, gt), lambda r, j: (0, j)),   # fused bias tile
            ],
            out_specs=pl.BlockSpec((rt, gt), lambda r, j: (r, j)),
        ),
        compiler_params=pltpu.CompilerParams(
            dimension_semantics=("parallel", "parallel"),
            vmem_limit_bytes=_vmem_limit_bytes(),
        ),
    )(x_rows, w_ih_packed, bias)


# --------------------- Pallas kernel 2: recurrent chunk loop ------------------
# grid = (batch tiles [parallel], time chunks [arbitrary/sequential]).

def _lstm_recurrent_kernel(pre_ref, whh_ref, len_ref, out_ref, h_scr, c_scr):
    tc = pre_ref.shape[1]          # time steps per chunk (static)
    hp = h_scr.shape[-1]           # padded hidden size (multiple of 128)
    chunk = pl.program_id(1)

    @pl.when(chunk == 0)           # new batch tile -> reset state
    def _():
        h_scr[...] = jnp.zeros_like(h_scr)
        c_scr[...] = jnp.zeros_like(c_scr)

    whh = whh_ref[...]             # (Hp, 4Hp)  MXU operand dtype (f32 or bf16)
    lens = len_ref[...]            # (Bt, 1) int32
    t0 = chunk * tc

    # State is carried in vregs across the statically-unrolled loop; the VMEM
    # scratch is only touched once per chunk (start read / end write).
    h = h_scr[...]                 # (Bt, Hp) f32
    c = c_scr[...]                 # (Bt, Hp) f32

    for t in range(tc):            # static unroll, static (lane-dense) slices
        pre_t = pre_ref[:, t, :].astype(jnp.float32)            # (Bt, 4Hp)
        gates = pre_t + jnp.dot(h.astype(whh.dtype), whh,
                                preferred_element_type=jnp.float32)

        i_g = _sigmoid(gates[:, 0 * hp:1 * hp])
        f_g = _sigmoid(gates[:, 1 * hp:2 * hp])
        g_g = jnp.tanh(gates[:, 2 * hp:3 * hp])
        o_g = _sigmoid(gates[:, 3 * hp:4 * hp])

        c_new = f_g * c + i_g * g_g
        h_new = o_g * jnp.tanh(c_new)

        valid = lens > (t0 + t)    # (Bt, 1), broadcasts over Hp
        # pack_padded_sequence: freeze state after the sequence ends;
        # pad_packed_sequence: zeros at invalid steps.
        h = jnp.where(valid, h_new, h)
        c = jnp.where(valid, c_new, c)
        out_ref[:, t, :] = jnp.where(valid, h_new, 0.0).astype(out_ref.dtype)

    h_scr[...] = h
    c_scr[...] = c


def _recurrent_pass(pre, w_hh_packed, lens, *, out_dtype, batch_tile, time_chunk,
                    single_buffer_weights):
    Bp, Tp, G = pre.shape
    Hp = w_hh_packed.shape[0]
    Bt, Tc = batch_tile, time_chunk

    whh_kwargs = {}
    if single_buffer_weights:
        # Grid-invariant weight: one VMEM buffer instead of the default two
        # (halves weight VMEM; needed for large H on v7x's 64 MiB VMEM).
        whh_kwargs["pipeline_mode"] = pl.Buffered(1)
    whh_spec = pl.BlockSpec((Hp, G), lambda b, c: (0, 0), **whh_kwargs)

    return pl.pallas_call(
        _lstm_recurrent_kernel,
        out_shape=jax.ShapeDtypeStruct((Bp, Tp, Hp), out_dtype),
        grid_spec=pltpu.PrefetchScalarGridSpec(
            num_scalar_prefetch=0,
            grid=(Bp // Bt, Tp // Tc),
            in_specs=[
                pl.BlockSpec((Bt, Tc, G), lambda b, c: (b, c, 0)),   # preactivations
                whh_spec,                                            # fused W_hh
                pl.BlockSpec((Bt, 1), lambda b, c: (b, 0)),          # lengths
            ],
            out_specs=pl.BlockSpec((Bt, Tc, Hp), lambda b, c: (b, c, 0)),
            scratch_shapes=[
                pltpu.VMEM((Bt, Hp), jnp.float32),   # h (carried across chunks)
                pltpu.VMEM((Bt, Hp), jnp.float32),   # c (carried across chunks)
            ],
        ),
        compiler_params=pltpu.CompilerParams(
            dimension_semantics=("parallel", "arbitrary"),   # batch // 2 TCs, time seq
            vmem_limit_bytes=_vmem_limit_bytes(),
        ),
    )(pre, w_hh_packed, lens)


# ----------------------------------- wrapper ----------------------------------

def dynamic_lstm_forward(x, x_len, w_ih, w_hh, b_ih, b_hh, hidden_size, *,
                         time_chunk=16, batch_tile=8, param_dtype=jnp.bfloat16):
    """
    x:      (B, T, I) float32   (batch_first)
    x_len:  (B,) host-concrete lengths (numpy); must be concrete because
            pad_packed_sequence truncates to max(x_len) (static output shape).
    w_ih:   (4, I, H)   w_hh: (4, H, H)   b_ih/b_hh: (4, 1, H)   gate order i,f,g,o
    param_dtype: dtype of MXU operands (weights / x / preactivations); bfloat16
            halves their VMEM+HBM, gate/state math stays f32 on all generations.
    returns (B, max(x_len), H)
    """
    B, T, I = x.shape
    H = hidden_size
    orig_dtype = x.dtype

    # Lane-dense hidden size (multiple of 128); padded units have zero
    # weights/bias so they remain exactly 0 and never affect real units.
    Hp = _round_up(H, 128)
    Gp = 4 * Hp

    Bt = _round_up(max(int(batch_tile), 1), 8)               # 8-sublane batch tile
    Bp = _round_up(B, Bt)
    Tc = min(_round_up(max(int(time_chunk), 1), 8), _round_up(T, 8))
    Tp = _round_up(T, Tc)

    # ---- pack parameters: fused, lane-padded gate dim (i|f|g|o) ----
    w_ih_p = _pack_gate_weights(w_ih, Hp).astype(param_dtype)               # (I, 4Hp)
    w_hh_p = _pack_gate_weights(w_hh, Hp, in_pad=Hp).astype(param_dtype)    # (Hp, 4Hp)
    bias_p = _pack_gate_bias(b_ih + b_hh, Hp)                               # (1, 4Hp) f32

    # ---- hoisted, parallel input projection (no transpose: batch_first layout
    #      flattens to rows in place) ----
    if (Bp, Tp) != (B, T):
        x = jnp.pad(x, ((0, Bp - B), (0, Tp - T), (0, 0)))
    x_rows = x.reshape(Bp * Tp, I).astype(param_dtype)
    pre = _input_projection(x_rows, w_ih_p, bias_p, out_dtype=param_dtype)
    pre = pre.reshape(Bp, Tp, Gp)                                           # batch-major

    lens_host = np.zeros((Bp, 1), np.int32)
    lens_host[:B, 0] = np.asarray(x_len).astype(np.int32).reshape(-1)
    lens = jnp.asarray(lens_host)

    try:
        out_full = _recurrent_pass(pre, w_hh_p, lens, out_dtype=orig_dtype,
                                   batch_tile=Bt, time_chunk=Tc,
                                   single_buffer_weights=True)
    except Exception:
        # TODO(synk): this jax version rejects pipeline_mode=pl.Buffered(1);
        # fall back to default double-buffered grid-invariant weights.
        out_full = _recurrent_pass(pre, w_hh_p, lens, out_dtype=orig_dtype,
                                   batch_tile=Bt, time_chunk=Tc,
                                   single_buffer_weights=False)

    t_out = int(np.max(np.asarray(x_len)))        # pad_packed_sequence max length
    return out_full[:B, :t_out, :H]

# TODO(synk): GRU/RNN cell types, num_layers > 1, dropout, the bidirectional
# average-merge and an explicit h0 are not implemented (module defaults used).


# ------------------------------ pure-JAX reference ----------------------------

def _reference(x, x_len, w_ih, w_hh, b_ih, b_hh, H):
    B, T, _ = x.shape
    h = jnp.zeros((B, H), jnp.float32)
    c = jnp.zeros((B, H), jnp.float32)
    lens = jnp.asarray(np.asarray(x_len), jnp.int32)
    outs = []
    for t in range(T):
        xt = x[:, t, :].astype(jnp.float32)
        g = [xt @ w_ih[k] + h @ w_hh[k] + b_ih[k] + b_hh[k] for k in range(4)]
        i_g, f_g = jax.nn.sigmoid(g[0]), jax.nn.sigmoid(g[1])
        g_g, o_g = jnp.tanh(g[2]), jax.nn.sigmoid(g[3])
        c_new = f_g * c + i_g * g_g
        h_new = o_g * jnp.tanh(c_new)
        mask = (lens[:, None] > t)
        h = jnp.where(mask, h_new, h)
        c = jnp.where(mask, c_new, c)
        outs.append(jnp.where(mask, h_new, 0.0))
    out = jnp.stack(outs, axis=1)
    return out[:, :int(np.max(np.asarray(x_len))), :]


# ------------------------------------ main -------------------------------------

if __name__ == "__main__":
    B, T, I, H = 2, 8, 32, 32

    key = jax.random.PRNGKey(0)
    kx, kwi, kwh, kbi, kbh = jax.random.split(key, 5)

    # torch.nn.LSTM-style init: U(-1/sqrt(H), 1/sqrt(H))
    bound = 1.0 / np.sqrt(H)
    w_ih = jax.random.uniform(kwi, (4, I, H), jnp.float32, -bound, bound)
    w_hh = jax.random.uniform(kwh, (4, H, H), jnp.float32, -bound, bound)
    b_ih = jax.random.uniform(kbi, (4, 1, H), jnp.float32, -bound, bound)
    b_hh = jax.random.uniform(kbh, (4, 1, H), jnp.float32, -bound, bound)

    x = jax.random.normal(kx, (B, T, I), jnp.float32)
    x_len = np.array([8, 5], dtype=np.int32)       # variable lengths, max == T

    ref = _reference(x, x_len, w_ih, w_hh, b_ih, b_hh, H)

    # f32 parameter path: tight check against the f32 reference.
    out_f32 = dynamic_lstm_forward(x, x_len, w_ih, w_hh, b_ih, b_hh, H,
                                   param_dtype=jnp.float32)
    out_f32 = jax.block_until_ready(out_f32)
    np.testing.assert_allclose(np.asarray(out_f32), np.asarray(ref),
                               rtol=1e-5, atol=1e-5)

    # bf16 MXU-operand path (recommended default on v6e/v7x): looser tolerance.
    out_bf16 = dynamic_lstm_forward(x, x_len, w_ih, w_hh, b_ih, b_hh, H,
                                    param_dtype=jnp.bfloat16)
    out_bf16 = jax.block_until_ready(out_bf16)
    np.testing.assert_allclose(np.asarray(out_bf16), np.asarray(ref),
                               rtol=5e-2, atol=5e-2)

    print("KERNEL_OK")
</pallas_src>

<mosaic_0001>
module attributes {stable_mosaic.version = 11 : i64} {
  func.func @_input_proj_kernel(%arg0: i32, %arg1: i32, %arg2: memref<64x32xf32, #tpu.memory_space<vmem>>, %arg3: memref<32x512xf32, #tpu.memory_space<vmem>>, %arg4: memref<1x512xf32, #tpu.memory_space<vmem>>, %arg5: memref<64x512xf32, #tpu.memory_space<vmem>>) attributes {dimension_semantics = [#tpu.dimension_semantics<parallel>, #tpu.dimension_semantics<parallel>], iteration_bounds = array<i64: 1, 1>, scalar_prefetch = 0 : i64, scratch_operands = 0 : i64, tpu.core_type = #tpu.core_type<tc>, window_params = [{transform_indices = @transform_0, window_bounds = array<i64: 64, 32>}, {transform_indices = @transform_1, window_bounds = array<i64: 32, 512>}, {transform_indices = @transform_2, window_bounds = array<i64: 1, 512>}, {transform_indices = @transform_3, window_bounds = array<i64: 64, 512>}]} {
    %c0 = arith.constant 0 : index
    %c0_0 = arith.constant 0 : index
    %0 = vector.load %arg2[%c0, %c0_0] : memref<64x32xf32, #tpu.memory_space<vmem>>, vector<64x32xf32>
    %c0_1 = arith.constant 0 : index
    %c0_2 = arith.constant 0 : index
    %1 = vector.load %arg3[%c0_1, %c0_2] : memref<32x512xf32, #tpu.memory_space<vmem>>, vector<32x512xf32>
    %cst = arith.constant dense<0.000000e+00> : vector<64x512xf32>
    %2 = tpu.matmul %0, %1, %cst {dimension_numbers = #tpu.dot_dimension_numbers<[1], [0], [0], [1], [0, 0, 1, 1], [], []>} : vector<64x32xf32>, vector<32x512xf32>, vector<64x512xf32> -> vector<64x512xf32>
    %c0_3 = arith.constant 0 : index
    %c0_4 = arith.constant 0 : index
    %3 = vector.load %arg4[%c0_3, %c0_4] : memref<1x512xf32, #tpu.memory_space<vmem>>, vector<1x512xf32>
    %4 = vector.broadcast %3 : vector<1x512xf32> to vector<64x512xf32>
    %5 = arith.addf %2, %4 : vector<64x512xf32>
    %c0_5 = arith.constant 0 : index
    %c0_6 = arith.constant 0 : index
    %6 = vector.load %arg5[%c0_5, %c0_6] : memref<64x512xf32, #tpu.memory_space<vmem>>, vector<64x512xf32>
    tpu.vector_store %arg5[%c0_5, %c0_6], %5 {strides = array<i32>} : memref<64x512xf32, #tpu.memory_space<vmem>>, vector<64x512xf32>,
    return
  }
  func.func @transform_0(%arg0: i32, %arg1: i32) -> (i32, i32) {
    %c0_i32 = arith.constant 0 : i32
    %c0_i32_0 = arith.constant 0 : i32
    return %arg0, %c0_i32 : i32, i32
  }
  func.func @transform_1(%arg0: i32, %arg1: i32) -> (i32, i32) {
    %c0_i32 = arith.constant 0 : i32
    %c0_i32_0 = arith.constant 0 : i32
    return %c0_i32, %arg1 : i32, i32
  }
  func.func @transform_2(%arg0: i32, %arg1: i32) -> (i32, i32) {
    %c0_i32 = arith.constant 0 : i32
    %c0_i32_0 = arith.constant 0 : i32
    return %c0_i32, %arg1 : i32, i32
  }
  func.func @transform_3(%arg0: i32, %arg1: i32) -> (i32, i32) {
    %c0_i32 = arith.constant 0 : i32
    return %arg0, %arg1 : i32, i32
  }
}

</mosaic_0001>

<bundles_post_ra>
// kernel: tpu_custom_call.1
= control target key start
LH: loop header
LB: loop body
LE: loop exit
PB: predicated region body
PF: predicated region fallthrough
CT: control target
= control target key end

     0   :  { %8 = vsyncpa [#allocation3], 0  ;;  %s691_s0 = inlined_call_operand.hbm [shape: f32[64,32], index: 0, kind: input, shape index: {}]   ;;  %s692_s1 = inlined_call_operand.hbm [shape: f32[32,512], index: 1, kind: input, shape index: {}]   ;;  %s693_s2 = inlined_call_operand.hbm [shape: f32[1,512], index: 2, kind: input, shape index: {}]   ;;  %s694_s3 = inlined_call_operand.hbm [shape: f32[64,512], index: 3, kind: output, shape index: {}]  }
   0x1   :  { %9 = vsyncpa [#allocation6], 0 }
   0x2   :  { %10 = vsyncpa [#allocation4], 0  ;;  %s536_s12 = smov [#allocation5]   ;;  %s442_s16 = scalar_lea.hbm %s692_s1, 2048 }
   0x3   :  { %s28_s13 = sshll.u32 %s536_s12, 4  ;;  %p443_p0 = scmp.ne.s32.totalorder %s692_s1, %s442_s16  ;;  %s29_s13 = int_to_ptr.vmem [resolvable:$true] %s28_s13 }
   0x4   :  { %p446_p1 = scmp.lt.u32.totalorder %s442_s16, %s692_s1 }
   0x6   :  { %p448_p2 = pnand %p446_p1, %p443_p0 }
   0x8   :  { %451 = shalt.err (!%p448_p2)
}
   0x9   :  { %s452_s21 = scalar_lea.vmem %s29_s13, 2048  ;;  %p457_p4 = scmp.lt.s32.totalorder %s29_s13, %s29_s13 }
   0xa   :  { %p453_p3 = scmp.ne.s32.totalorder %s29_s13, %s452_s21  ;;  %p458_p5 = scmp.lt.s32.totalorder %s452_s21, %s452_s21 }
   0xc   :  { %p459_p6 = por %p458_p5, %p457_p4 }
   0xe   :  { %p460_p7 = pnand %p459_p6, %p453_p3 }
  0x10   :  { %463 = shalt.err (!%p460_p7)
}
  0x11   :  { %s537_s22 = smov 512   ;;  %s538_s23 = smov 32  }
  0x12   :  { %34 = dma.hbm_to_vmem [thread:$0]  %s692_s1, 2048, %s29_s13, [#allocation6], %s537_s22, %s537_s22, %s538_s23  }
  0x13   :  { %s539_s26 = smov [#allocation2]   ;;  %s464_s30 = scalar_lea.hbm %s691_s0, 1024 }
  0x14   :  { %s16_s27 = sshll.u32 %s539_s26, 4  ;;  %p465_p8 = scmp.ne.s32.totalorder %s691_s0, %s464_s30  ;;  %s17_s27 = int_to_ptr.vmem [resolvable:$true] %s16_s27 }
  0x15   :  { %p468_p9 = scmp.lt.u32.totalorder %s464_s30, %s691_s0 }
  0x17   :  { %p470_p10 = pnand %p468_p9, %p465_p8 }
  0x19   :  { %473 = shalt.err (!%p470_p10)
}
  0x1a   :  { %s474_s8 = scalar_lea.vmem %s17_s27, 1024  ;;  %p479_p12 = scmp.lt.s32.totalorder %s17_s27, %s17_s27 }
  0x1b   :  { %p475_p11 = scmp.ne.s32.totalorder %s17_s27, %s474_s8  ;;  %p480_p13 = scmp.lt.s32.totalorder %s474_s8, %s474_s8 }
  0x1d   :  { %p481_p0 = por %p480_p13, %p479_p12 }
  0x1f   :  { %p482_p1 = pnand %p481_p0, %p475_p11 }
  0x21   :  { %485 = shalt.err (!%p482_p1)
}
  0x22   :  { %s540_s1 = smov 128   ;;  %s541_s9 = smov 8  }
  0x23   :  { %22 = dma.hbm_to_vmem [thread:$0]  %s691_s0, 1024, %s17_s27, [#allocation3], %s540_s1, %s540_s1, %s541_s9  }
  0x24   :  { %s542_s12 = smov [#allocation7]   ;;  %s486_s16 = scalar_lea.hbm %s693_s2, 64 }
  0x25   :  { %s41_s13 = sshll.u32 %s542_s12, 4  ;;  %p487_p2 = scmp.ne.s32.totalorder %s693_s2, %s486_s16  ;;  %s42_s13 = int_to_ptr.vmem [resolvable:$true] %s41_s13 }
  0x26   :  { %p490_p3 = scmp.lt.u32.totalorder %s486_s16, %s693_s2 }
  0x28   :  { %p492_p4 = pnand %p490_p3, %p487_p2 }
  0x2a   :  { %495 = shalt.err (!%p492_p4)
}
  0x2b   :  { %s496_s21 = scalar_lea.vmem %s42_s13, 64  ;;  %p501_p6 = scmp.lt.s32.totalorder %s42_s13, %s42_s13 }
  0x2c   :  { %p497_p5 = scmp.ne.s32.totalorder %s42_s13, %s496_s21  ;;  %p502_p7 = scmp.lt.s32.totalorder %s496_s21, %s496_s21 }
  0x2e   :  { %p503_p8 = por %p502_p7, %p501_p6 }
  0x30   :  { %p504_p9 = pnand %p503_p8, %p497_p5 }
  0x32   :  { %507 = shalt.err (!%p504_p9)
}
  0x33   :  { %44 = dma.hbm_to_vmem [thread:$0]  %s693_s2, 64, %s42_s13, [#allocation6]  }
  0x34   :  { %530 = dma.done.wait [#allocation3], 1024  }
  0x35   :  { %531 = vsyncadd [#allocation3], 4294966272 }
  0x36   :  { %532 = dma.done.wait [#allocation6], 2112  }
  0x37   :  { %533 = vsyncadd [#allocation6], 4294965184  ;;  %v543_v0 = vmov 0.0   ;;  %v63_v1 = vld [vmem:[#allocation5 + $0x8] sm:$0xff]  ;;  %v65_v3 = vld [vmem:[#allocation5 + $0x18] sm:$0xff]  ;;  %vm100_vm0 = vcmask 261120   ;;  %v80_v33 = vlaneseq }
  0x38   :  { %189 = vmatprep.mubr.f32.mxu0 %v543_v0  ;;  %302 = vmatprep.mubr.f32.mxu1 %v543_v0  ;;  %v67_v2 = vld [vmem:[#allocation5 + $0x28] sm:$0xff]  ;;  %v69_v5 = vld [vmem:[#allocation5 + $0x38] sm:$0xff]  ;;  %v62_v6 = vld [vmem:[#allocation5] sm:$0xff]  ;;  %s544_s2 = smov [#allocation8]  }
  0x39   :  { %v417_v4 = vpack.c.bf16 %v67_v2, %v63_v1  ;;  %v66_v7 = vld [vmem:[#allocation5 + $0x20] sm:$0xff]  ;;  %v425_v8 = vpack.c.bf16 %v69_v5, %v65_v3  ;;  %v64_v10 = vld [vmem:[#allocation5 + $0x10] sm:$0xff]  ;;  %v71_v12 = vld [vmem:[#allocation5 + $0x48] sm:$0xff]  ;;  %v81_v34 = vshrl.u32 %v80_v33, 7  ;;  %s388_s25 = sshll.u32 %s544_s2, 4  ;;  %s389_s25 = int_to_ptr.vmem [resolvable:$true] %s388_s25 }
  0x3a   :  { %v419_v9 = vpack.c.bf16 %v66_v7, %v62_v6  ;;  %v68_v11 = vld [vmem:[#allocation5 + $0x30] sm:$0xff]  ;;  %v75_v14 = vld [vmem:[#allocation5 + $0x68] sm:$0xff]  ;;  %v73_v15 = vld [vmem:[#allocation5 + $0x58] sm:$0xff]  ;;  %s508_s26 = scalar_lea.vmem %s389_s25, 4096  ;;  %p513_p11 = scmp.lt.s32.totalorder %s389_s25, %s389_s25 }
  0x3b   :  { %418 = vmatprep.subr.bf16.mxu0 %v417_v4  ;;  %v427_v13 = vpack.c.bf16 %v68_v11, %v64_v10  ;;  %v77_v16 = vld [vmem:[#allocation5 + $0x78] sm:$0xff]  ;;  %426 = vmatprep.subr.bf16.mxu1 %v425_v8  ;;  %v421_v17 = vpack.c.bf16 %v75_v14, %v71_v12  ;;  %v70_v19 = vld [vmem:[#allocation5 + $0x40] sm:$0xff]  ;;  %v72_v21 = vld [vmem:[#allocation5 + $0x50] sm:$0xff]  ;;  %v82_v35 = vsub.s32 0, %v81_v34  ;;  %v90_v37 = vsub.s32 2, %v81_v34  ;;  %p509_p10 = scmp.ne.s32.totalorder %s389_s25, %s508_s26  ;;  %p514_p12 = scmp.lt.s32.totalorder %s508_s26, %s508_s26 }
  0x3c   :  { %420 = vmatpush1.bf16.msra.mxu0 %v419_v9  ;;  %v429_v18 = vpack.c.bf16 %v77_v16, %v73_v15  ;;  %v74_v20 = vld [vmem:[#allocation5 + $0x60] sm:$0xff]  ;;  %v76_v23 = vld [vmem:[#allocation5 + $0x70] sm:$0xff]  ;;  %v55_v26 = vld [vmem:[#allocation2 + $0x8] sm:$0xff]  ;;  %v86_v38 = vsub.s32 1, %v81_v34  ;;  %v94_v39 = vsub.s32 3, %v81_v34 }
  0x3d   :  { %428 = vmatpush1.bf16.msra.mxu1 %v427_v13  ;;  %v423_v22 = vpack.c.bf16 %v74_v20, %v70_v19  ;;  %422 = vmatprep.subr.bf16.mxu0 %v421_v17  ;;  %v431_v24 = vpack.c.bf16 %v76_v23, %v72_v21  ;;  %v54_v25 = vld [vmem:[#allocation2] sm:$0xff]  ;;  %v56_v27 = vld [vmem:[#allocation2 + $0x10] sm:$0xff]  ;;  %v57_v28 = vld [vmem:[#allocation2 + $0x18] sm:$0xff]  ;;  %p515_p13 = por %p514_p12, %p513_p11 }
  0x3e   :  { %430 = vmatprep.subr.bf16.mxu1 %v429_v18  ;;  %v58_v29 = vld [vmem:[#allocation2 + $0x20] sm:$0xff]  ;;  %v59_v30 = vld [vmem:[#allocation2 + $0x28] sm:$0xff]  ;;  %v60_v31 = vld [vmem:[#allocation2 + $0x30] sm:$0xff] }
  0x3f   :  { %v61_v32 = vld [vmem:[#allocation2 + $0x38] sm:$0xff]  ;;  %v78_v36 = vld [vmem:[#allocation7] sm:$0xf]  ;;  %p516_p0 = pnand %p515_p13, %p509_p10 }
  0x40   :  { %424 = vmatpush1.bf16.msra.mxu0 %v423_v22  ;;  %v636_v40 = vrot.slane %v78_v36, %v82_v35  ;;  %v638_v41 = vrot.slane %v78_v36, %v90_v37  ;;  %v640_v42 = vrot.slane %v78_v36, %v86_v38  ;;  %v642_v43 = vrot.slane %v78_v36, %v94_v39 }
  0x41   :  { %432 = vmatpush1.bf16.msra.mxu1 %v431_v24 }
  0x43   :  { %401 = vmatmul.mubr.msk.f32.vlgmr.msra.gmra.mrb[0].mxu0 %vm100_vm0, %v54_v25 }
  0x44   :  { %409 = vmatmul.mubr.msk.f32.vlgmr.msra.gmra.mrb[0].mxu1 %vm100_vm0, %v54_v25  ;;  %195 = vmatprep.mubr.f32.mxu0 %v543_v0 }
  0x45   :  { %308 = vmatprep.mubr.f32.mxu1 %v543_v0 }
  0x47   :  { %402 = vmatmul.mubr.msk.f32.gmra.mrb[2].mxu0 %vm100_vm0, %v55_v26 }
  0x48   :  { %410 = vmatmul.mubr.msk.f32.gmra.mrb[2].mxu1 %vm100_vm0, %v55_v26  ;;  %201 = vmatprep.mubr.f32.mxu0 %v543_v0 }
  0x49   :  { %314 = vmatprep.mubr.f32.mxu1 %v543_v0 }
  0x4b   :  { %403 = vmatmul.mubr.msk.f32.gmra.mrb[4].mxu0 %vm100_vm0, %v56_v27 }
  0x4c   :  { %411 = vmatmul.mubr.msk.f32.gmra.mrb[4].mxu1 %vm100_vm0, %v56_v27  ;;  %207 = vmatprep.mubr.f32.mxu0 %v543_v0 }
  0x4d   :  { %320 = vmatprep.mubr.f32.mxu1 %v543_v0 }
  0x4f   :  { %404 = vmatmul.mubr.msk.f32.gmra.mrb[6].mxu0 %vm100_vm0, %v57_v28 }
  0x50   :  { %412 = vmatmul.mubr.msk.f32.gmra.mrb[6].mxu1 %vm100_vm0, %v57_v28  ;;  %213 = vmatprep.mubr.f32.mxu0 %v543_v0 }
  0x51   :  { %326 = vmatprep.mubr.f32.mxu1 %v543_v0 }
  0x53   :  { %405 = vmatmul.mubr.msk.f32.gmra.mrb[8].mxu0 %vm100_vm0, %v58_v29 }
  0x54   :  { %413 = vmatmul.mubr.msk.f32.gmra.mrb[8].mxu1 %vm100_vm0, %v58_v29  ;;  %219 = vmatprep.mubr.f32.mxu0 %v543_v0 }
  0x55   :  { %332 = vmatprep.mubr.f32.mxu1 %v543_v0 }
  0x57   :  { %406 = vmatmul.mubr.msk.f32.gmra.mrb[10].mxu0 %vm100_vm0, %v59_v30 }
  0x58   :  { %414 = vmatmul.mubr.msk.f32.gmra.mrb[10].mxu1 %vm100_vm0, %v59_v30  ;;  %225 = vmatprep.mubr.f32.mxu0 %v543_v0 }
  0x59   :  { %338 = vmatprep.mubr.f32.mxu1 %v543_v0 }
  0x5b   :  { %407 = vmatmul.mubr.msk.f32.gmra.mrb[12].mxu0 %vm100_vm0, %v60_v31 }
  0x5c   :  { %415 = vmatmul.mubr.msk.f32.gmra.mrb[12].mxu1 %vm100_vm0, %v60_v31  ;;  %231 = vmatprep.mubr.f32.mxu0 %v543_v0 }
  0x5d   :  { %344 = vmatprep.mubr.f32.mxu1 %v543_v0 }
  0x5f   :  { %408 = vmatmul.mubr.msk.f32.gmra.mrb[14].mxu0 %vm100_vm0, %v61_v32 }
  0x60   :  { %416 = vmatmul.mubr.msk.f32.gmra.mrb[14].mxu1 %vm100_vm0, %v61_v32 }
 0x116   :  { %v191_v44 = vpop.f32.mrb[0].mxu0 }
 0x117   :  { %v192_v45 = vadd.f32 %v191_v44, %v636_v40  ;;  %v304_v46 = vpop.f32.mrb[0].mxu1  ;;  %v193_v47 = vpop.f32.mrb[1].mxu0 }
 0x118   :  { %v305_v48 = vadd.f32 %v304_v46, %v638_v41  ;;  %v194_v49 = vadd.f32 %v193_v47, %v640_v42  ;;  %v306_v50 = vpop.f32.mrb[1].mxu1 }
 0x119   :  { %351 = vst [vmem:[#allocation8] sm:$0xff] %v192_v45  ;;  %v307_v51 = vadd.f32 %v306_v50, %v642_v43 }
 0x11a   :  { %353 = vst [vmem:[#allocation8 + $0x10] sm:$0xff] %v305_v48  ;;  %352 = vst [vmem:[#allocation8 + $0x8] sm:$0xff] %v194_v49  ;;  %v197_v52 = vpop.f32.mrb[2].mxu0 }
 0x11b   :  { %354 = vst [vmem:[#allocation8 + $0x18] sm:$0xff] %v307_v51  ;;  %v198_v53 = vadd.f32 %v197_v52, %v636_v40  ;;  %v310_v54 = vpop.f32.mrb[2].mxu1  ;;  %v199_v55 = vpop.f32.mrb[3].mxu0 }
 0x11c   :  { %v311_v56 = vadd.f32 %v310_v54, %v638_v41  ;;  %v200_v57 = vadd.f32 %v199_v55, %v640_v42  ;;  %v312_v58 = vpop.f32.mrb[3].mxu1 }
 0x11d   :  { %355 = vst [vmem:[#allocation8 + $0x20] sm:$0xff] %v198_v53  ;;  %v313_v59 = vadd.f32 %v312_v58, %v642_v43 }
 0x11e   :  { %357 = vst [vmem:[#allocation8 + $0x30] sm:$0xff] %v311_v56  ;;  %356 = vst [vmem:[#allocation8 + $0x28] sm:$0xff] %v200_v57  ;;  %v203_v60 = vpop.f32.mrb[4].mxu0 }
 0x11f   :  { %358 = vst [vmem:[#allocation8 + $0x38] sm:$0xff] %v313_v59  ;;  %v204_v61 = vadd.f32 %v203_v60, %v636_v40  ;;  %v316_v62 = vpop.f32.mrb[4].mxu1  ;;  %v205_v63 = vpop.f32.mrb[5].mxu0 }
 0x120   :  { %v317_v0 = vadd.f32 %v316_v62, %v638_v41  ;;  %v206_v1 = vadd.f32 %v205_v63, %v640_v42  ;;  %v318_v2 = vpop.f32.mrb[5].mxu1 }
 0x121   :  { %359 = vst [vmem:[#allocation8 + $0x40] sm:$0xff] %v204_v61  ;;  %v319_v3 = vadd.f32 %v318_v2, %v642_v43 }
 0x122   :  { %361 = vst [vmem:[#allocation8 + $0x50] sm:$0xff] %v317_v0  ;;  %360 = vst [vmem:[#allocation8 + $0x48] sm:$0xff] %v206_v1  ;;  %v209_v4 = vpop.f32.mrb[6].mxu0 }
 0x123   :  { %362 = vst [vmem:[#allocation8 + $0x58] sm:$0xff] %v319_v3  ;;  %v210_v5 = vadd.f32 %v209_v4, %v636_v40  ;;  %v322_v6 = vpop.f32.mrb[6].mxu1  ;;  %v211_v7 = vpop.f32.mrb[7].mxu0 }
 0x124   :  { %v323_v8 = vadd.f32 %v322_v6, %v638_v41  ;;  %v212_v9 = vadd.f32 %v211_v7, %v640_v42  ;;  %v324_v10 = vpop.f32.mrb[7].mxu1 }
 0x125   :  { %363 = vst [vmem:[#allocation8 + $0x60] sm:$0xff] %v210_v5  ;;  %v325_v11 = vadd.f32 %v324_v10, %v642_v43 }
 0x126   :  { %365 = vst [vmem:[#allocation8 + $0x70] sm:$0xff] %v323_v8  ;;  %364 = vst [vmem:[#allocation8 + $0x68] sm:$0xff] %v212_v9  ;;  %v215_v12 = vpop.f32.mrb[8].mxu0 }
 0x127   :  { %366 = vst [vmem:[#allocation8 + $0x78] sm:$0xff] %v325_v11  ;;  %v216_v13 = vadd.f32 %v215_v12, %v636_v40  ;;  %v328_v14 = vpop.f32.mrb[8].mxu1  ;;  %v217_v15 = vpop.f32.mrb[9].mxu0 }
 0x128   :  { %v329_v16 = vadd.f32 %v328_v14, %v638_v41  ;;  %v218_v17 = vadd.f32 %v217_v15, %v640_v42  ;;  %v330_v18 = vpop.f32.mrb[9].mxu1 }
 0x129   :  { %367 = vst [vmem:[#allocation8 + $0x80] sm:$0xff] %v216_v13  ;;  %v331_v19 = vadd.f32 %v330_v18, %v642_v43 }
 0x12a   :  { %369 = vst [vmem:[#allocation8 + $0x90] sm:$0xff] %v329_v16  ;;  %368 = vst [vmem:[#allocation8 + $0x88] sm:$0xff] %v218_v17  ;;  %v221_v20 = vpop.f32.mrb[10].mxu0 }
 0x12b   :  { %370 = vst [vmem:[#allocation8 + $0x98] sm:$0xff] %v331_v19  ;;  %v222_v21 = vadd.f32 %v221_v20, %v636_v40  ;;  %v334_v22 = vpop.f32.mrb[10].mxu1  ;;  %v223_v23 = vpop.f32.mrb[11].mxu0 }
 0x12c   :  { %v335_v24 = vadd.f32 %v334_v22, %v638_v41  ;;  %v224_v25 = vadd.f32 %v223_v23, %v640_v42  ;;  %v336_v26 = vpop.f32.mrb[11].mxu1 }
 0x12d   :  { %371 = vst [vmem:[#allocation8 + $0xa0] sm:$0xff] %v222_v21  ;;  %v337_v27 = vadd.f32 %v336_v26, %v642_v43 }
 0x12e   :  { %373 = vst [vmem:[#allocation8 + $0xb0] sm:$0xff] %v335_v24  ;;  %372 = vst [vmem:[#allocation8 + $0xa8] sm:$0xff] %v224_v25  ;;  %v227_v28 = vpop.f32.mrb[12].mxu0 }
 0x12f   :  { %374 = vst [vmem:[#allocation8 + $0xb8] sm:$0xff] %v337_v27  ;;  %v228_v29 = vadd.f32 %v227_v28, %v636_v40  ;;  %v340_v30 = vpop.f32.mrb[12].mxu1  ;;  %v229_v31 = vpop.f32.mrb[13].mxu0 }
 0x130   :  { %v341_v32 = vadd.f32 %v340_v30, %v638_v41  ;;  %v230_v33 = vadd.f32 %v229_v31, %v640_v42  ;;  %v342_v34 = vpop.f32.mrb[13].mxu1 }
 0x131   :  { %375 = vst [vmem:[#allocation8 + $0xc0] sm:$0xff] %v228_v29  ;;  %v343_v35 = vadd.f32 %v342_v34, %v642_v43 }
 0x132   :  { %377 = vst [vmem:[#allocation8 + $0xd0] sm:$0xff] %v341_v32  ;;  %376 = vst [vmem:[#allocation8 + $0xc8] sm:$0xff] %v230_v33  ;;  %v233_v36 = vpop.f32.mrb[14].mxu0 }
 0x133   :  { %378 = vst [vmem:[#allocation8 + $0xd8] sm:$0xff] %v343_v35  ;;  %v234_v37 = vadd.f32 %v233_v36, %v636_v40  ;;  %v346_v38 = vpop.f32.mrb[14].mxu1  ;;  %v235_v39 = vpop.f32.mrb[15].mxu0 }
 0x134   :  { %v347_v44 = vadd.f32 %v346_v38, %v638_v41  ;;  %v236_v45 = vadd.f32 %v235_v39, %v640_v42  ;;  %v348_v46 = vpop.f32.mrb[15].mxu1 }
 0x135   :  { %379 = vst [vmem:[#allocation8 + $0xe0] sm:$0xff] %v234_v37  ;;  %v349_v47 = vadd.f32 %v348_v46, %v642_v43 }
 0x136   :  { %381 = vst [vmem:[#allocation8 + $0xf0] sm:$0xff] %v347_v44  ;;  %380 = vst [vmem:[#allocation8 + $0xe8] sm:$0xff] %v236_v45 }
 0x137   :  { %382 = vst [vmem:[#allocation8 + $0xf8] sm:$0xff] %v349_v47 }
 0x138   :  { %519 = shalt.err (!%p516_p0)
}
 0x139   :  { %s520_s29 = scalar_lea.hbm %s694_s3, 4096 }
 0x13a   :  { %p521_p1 = scmp.ne.s32.totalorder %s694_s3, %s520_s29  ;;  %p524_p2 = scmp.lt.u32.totalorder %s520_s29, %s694_s3 }
 0x13c   :  { %p526_p3 = pnand %p524_p2, %p521_p1 }
 0x13e   :  { %529 = shalt.err (!%p526_p3)
}
 0x13f   :  { %394 = dma.vmem_to_hbm [thread:$0]  %s389_s25, 4096, %s694_s3, [#allocation4], %s537_s22, %s537_s22, %s538_s23  }
 0x140   :  { %534 = dma.done.wait [#allocation4], 4096  }
 0x141   :  { %535 = vsyncadd [#allocation4], 4294963200 }
 0x142   :  { %398 = vsyncpa [#allocation3], 1 }
 0x143   :  { %399 = vsyncpa [#allocation6], 1 }
 0x144   :  { %400 = vsyncpa [#allocation4], 1 }

</bundles_post_ra>
